<compile_context>
chip_gen: v7x
topology: tpu7x:2x2x1
jax: 0.10.0
libtpu: 0.0.40
codegen_flags: <defaults>
</compile_context>

<pallas_src>
import jax
import jax.numpy as jnp
from jax.experimental import pallas as pl
from jax.experimental.pallas import tpu as pltpu


def _round_up(x, m):
    return ((x + m - 1) // m) * m


def _spectral_conv_kernel(x_ref, k_ref, b_ref, o_ref):
    # x_ref: (C_in*V, tm)        lane-dense input tile
    # k_ref: (C_out*V, C_in*V)   fused (conv x adjacency) operator, resident
    # b_ref: (C_out*V, 1)        bias folded through the A contraction
    # o_ref: (C_out*V, tm)       lane-dense output tile
    z = jnp.dot(k_ref[...], x_ref[...], preferred_element_type=jnp.float32)
    o_ref[...] = (z + b_ref[...]).astype(o_ref.dtype)


def spectral_convolution(x_nctv, weight, bias, A, *, tm=512):
    """x_nctv: (N, C_in, T, V); weight: (C_out, C_in); bias: (C_out,);
    A: (V, V).  Returns (N, C_out, T, V) matching the PyTorch forward."""
    N, C_in, T, V = x_nctv.shape
    C_out = weight.shape[0]
    M = N * T

    # Lane-dense layout: (N, C_in, T, V) -> (C_in, V, N, T) -> (C_in*V, M)
    # (row = c*V + v, col = n*T + t).
    x_cvm = jnp.transpose(x_nctv, (1, 3, 0, 2)).reshape(C_in * V, M)

    # Tile size: multiple of 128, no larger than needed for small inputs.
    tm = _round_up(int(tm), 128)
    tm_eff = min(tm, _round_up(M, 128))
    Mp = _round_up(M, tm_eff)
    if Mp != M:
        x_cvm = jnp.pad(x_cvm, ((0, 0), (0, Mp - M)))

    # Fused operator K[(o,w), (c,v)] = W[o,c] * A[v,w]  and folded bias
    # b_eff[(o,w)] = b[o] * sum_v A[v,w]  (bias is applied BEFORE the A
    # contraction in the reference, hence the fold through column sums).
    f32 = jnp.float32
    K = (weight.astype(f32)[:, None, :, None] *
         A.astype(f32).T[None, :, None, :]).reshape(C_out * V, C_in * V)
    b_eff = (bias.astype(f32)[:, None] *
             jnp.sum(A.astype(f32), axis=0)[None, :]).reshape(C_out * V, 1)

    # VMEM budget: double-buffered in/out tiles + resident K and bias,
    # with headroom; clamp into [32 MiB, 64 MiB] (v7x physical VMEM is 64 MiB).
    itemsize = jnp.dtype(x_nctv.dtype).itemsize
    vmem_bytes = 2 * (C_in * V + C_out * V) * tm_eff * itemsize
    vmem_bytes += (C_out * V) * (C_in * V + 1) * 4
    vmem_bytes = int(vmem_bytes * 1.5) + (1 << 20)
    vmem_limit = min(64 << 20, max(32 << 20, vmem_bytes))

    grid = (Mp // tm_eff,)
    out = pl.pallas_call(
        _spectral_conv_kernel,
        out_shape=jax.ShapeDtypeStruct((C_out * V, Mp), x_nctv.dtype),
        grid_spec=pltpu.PrefetchScalarGridSpec(
            num_scalar_prefetch=0,
            grid=grid,
            in_specs=[
                pl.BlockSpec((C_in * V, tm_eff), lambda m: (0, m)),
                pl.BlockSpec((C_out * V, C_in * V), lambda m: (0, 0)),
                pl.BlockSpec((C_out * V, 1), lambda m: (0, 0)),
            ],
            out_specs=pl.BlockSpec((C_out * V, tm_eff), lambda m: (0, m)),
        ),
        compiler_params=pltpu.CompilerParams(
            dimension_semantics=("parallel",),
            vmem_limit_bytes=vmem_limit,
        ),
    )(x_cvm, K, b_eff)

    # (C_out*V, Mp) -> drop padding -> (C_out, V, N, T) -> (N, C_out, T, V)
    out = out[:, :M].reshape(C_out, V, N, T)
    return jnp.transpose(out, (2, 0, 3, 1))


def _reference(x_nctv, weight, bias, A):
    # Plain-JAX reference of the PyTorch forward.
    y = jnp.einsum('nctv,oc->notv', x_nctv, weight) + bias[None, :, None, None]
    return jnp.einsum('nctv,vw->nctw', y, A)


if __name__ == "__main__":
    key = jax.random.PRNGKey(0)
    k_x, k_w, k_b, k_a = jax.random.split(key, 4)

    # Shapes implied by the module: X is (N, C_in, T, V), A is (V, V).
    N, C_in, C_out, T, V = 2, 4, 2, 8, 16

    x = jax.random.normal(k_x, (N, C_in, T, V), dtype=jnp.float32)

    # Deterministic Conv2d(1x1) init, PyTorch-style uniform bounds.
    bound = 1.0 / (C_in ** 0.5)
    weight = jax.random.uniform(k_w, (C_out, C_in), jnp.float32, -bound, bound)
    bias = jax.random.uniform(k_b, (C_out,), jnp.float32, -bound, bound)

    # Deterministic synthetic adjacency matrix.
    A = jax.random.uniform(k_a, (V, V), jnp.float32, 0.0, 1.0)

    out = spectral_convolution(x, weight, bias, A)
    out = jax.block_until_ready(out)

    ref = _reference(x, weight, bias, A)
    assert out.shape == (N, C_out, T, V)
    assert jnp.allclose(out, ref, atol=1e-4, rtol=1e-4)

    # TODO(synk): self.activation is constructed in __init__ but never applied
    # in forward(), so it is intentionally omitted here.
    print("KERNEL_OK")
</pallas_src>

<mosaic_0001>
module attributes {stable_mosaic.version = 11 : i64} {
  func.func @_spectral_conv_kernel(%arg0: i32, %arg1: memref<64x128xf32, #tpu.memory_space<vmem>>, %arg2: memref<32x64xf32, #tpu.memory_space<vmem>>, %arg3: memref<32x1xf32, #tpu.memory_space<vmem>>, %arg4: memref<32x128xf32, #tpu.memory_space<vmem>>) attributes {dimension_semantics = [#tpu.dimension_semantics<parallel>], iteration_bounds = array<i64: 1>, scalar_prefetch = 0 : i64, scratch_operands = 0 : i64, tpu.core_type = #tpu.core_type<tc>, window_params = [{transform_indices = @transform_0, window_bounds = array<i64: 64, 128>}, {pipeline_mode = #tpu.pipeline_mode<synchronous>, transform_indices = @transform_1, window_bounds = array<i64: 32, 64>}, {pipeline_mode = #tpu.pipeline_mode<synchronous>, transform_indices = @transform_2, window_bounds = array<i64: 32, 1>}, {transform_indices = @transform_3, window_bounds = array<i64: 32, 128>}]} {
    %c0 = arith.constant 0 : index
    %c0_0 = arith.constant 0 : index
    %0 = vector.load %arg2[%c0, %c0_0] : memref<32x64xf32, #tpu.memory_space<vmem>>, vector<32x64xf32>
    %c0_1 = arith.constant 0 : index
    %c0_2 = arith.constant 0 : index
    %1 = vector.load %arg1[%c0_1, %c0_2] : memref<64x128xf32, #tpu.memory_space<vmem>>, vector<64x128xf32>
    %cst = arith.constant dense<0.000000e+00> : vector<32x128xf32>
    %2 = tpu.matmul %0, %1, %cst {dimension_numbers = #tpu.dot_dimension_numbers<[1], [0], [0], [1], [0, 0, 1, 1], [], []>} : vector<32x64xf32>, vector<64x128xf32>, vector<32x128xf32> -> vector<32x128xf32>
    %c0_3 = arith.constant 0 : index
    %c0_4 = arith.constant 0 : index
    %3 = vector.load %arg3[%c0_3, %c0_4] : memref<32x1xf32, #tpu.memory_space<vmem>>, vector<32x1xf32>
    %4 = vector.broadcast %3 : vector<32x1xf32> to vector<32x128xf32>
    %5 = arith.addf %2, %4 : vector<32x128xf32>
    %c0_5 = arith.constant 0 : index
    %c0_6 = arith.constant 0 : index
    %6 = vector.load %arg4[%c0_5, %c0_6] : memref<32x128xf32, #tpu.memory_space<vmem>>, vector<32x128xf32>
    tpu.vector_store %arg4[%c0_5, %c0_6], %5 {strides = array<i32>} : memref<32x128xf32, #tpu.memory_space<vmem>>, vector<32x128xf32>,
    return
  }
  func.func @transform_0(%arg0: i32) -> (i32, i32) {
    %c0_i32 = arith.constant 0 : i32
    %c0_i32_0 = arith.constant 0 : i32
    return %c0_i32, %arg0 : i32, i32
  }
  func.func @transform_1(%arg0: i32) -> (i32, i32) {
    %c0_i32 = arith.constant 0 : i32
    %c0_i32_0 = arith.constant 0 : i32
    %c0_i32_1 = arith.constant 0 : i32
    return %c0_i32, %c0_i32_0 : i32, i32
  }
  func.func @transform_2(%arg0: i32) -> (i32, i32) {
    %c0_i32 = arith.constant 0 : i32
    %c0_i32_0 = arith.constant 0 : i32
    %c0_i32_1 = arith.constant 0 : i32
    return %c0_i32, %c0_i32_0 : i32, i32
  }
  func.func @transform_3(%arg0: i32) -> (i32, i32) {
    %c0_i32 = arith.constant 0 : i32
    %c0_i32_0 = arith.constant 0 : i32
    return %c0_i32, %arg0 : i32, i32
  }
}

</mosaic_0001>

<bundles_post_ra>
// kernel: tpu_custom_call.1
= control target key start
LH: loop header
LB: loop body
LE: loop exit
PB: predicated region body
PF: predicated region fallthrough
CT: control target
= control target key end

     0   :  { %8 = vsyncpa [#allocation3], 0  ;;  %s384_s0 = inlined_call_operand.hbm [shape: f32[64,128], index: 0, kind: input, shape index: {}]   ;;  %s385_s1 = inlined_call_operand.vmem [shape: f32[32,64], index: 1, kind: input, shape index: {}]   ;;  %s386_s2 = inlined_call_operand.vmem [shape: f32[32,1], index: 2, kind: input, shape index: {}]   ;;  %s387_s3 = inlined_call_operand.hbm [shape: f32[32,128], index: 3, kind: output, shape index: {}]  }
   0x1   :  { %9 = vsyncpa [#allocation4], 0  ;;  %s301_s12 = smov [#allocation2]   ;;  %s253_s16 = scalar_lea.hbm %s384_s0, 1024 }
   0x2   :  { %s15_s13 = sshll.u32 %s301_s12, 4  ;;  %p254_p0 = scmp.ne.s32.totalorder %s384_s0, %s253_s16  ;;  %s16_s13 = int_to_ptr.vmem [resolvable:$true] %s15_s13 }
   0x3   :  { %p257_p1 = scmp.lt.u32.totalorder %s253_s16, %s384_s0 }
   0x5   :  { %p259_p2 = pnand %p257_p1, %p254_p0 }
   0x7   :  { %262 = shalt.err (!%p259_p2)
}
   0x8   :  { %s263_s21 = scalar_lea.vmem %s16_s13, 1024  ;;  %p268_p4 = scmp.lt.s32.totalorder %s16_s13, %s16_s13 }
   0x9   :  { %p264_p3 = scmp.ne.s32.totalorder %s16_s13, %s263_s21  ;;  %p269_p5 = scmp.lt.s32.totalorder %s263_s21, %s263_s21 }
   0xb   :  { %p270_p6 = por %p269_p5, %p268_p4 }
   0xd   :  { %p271_p7 = pnand %p270_p6, %p264_p3 }
   0xf   :  { %274 = shalt.err (!%p271_p7)
}
  0x10   :  { %s302_s22 = smov 128   ;;  %s303_s23 = smov 8  }
  0x11   :  { %21 = dma.hbm_to_vmem [thread:$0]  %s384_s0, 1024, %s16_s13, [#allocation3], %s302_s22, %s302_s22, %s303_s23  }
  0x12   :  { %297 = dma.done.wait [#allocation3], 1024  }
  0x13   :  { %298 = vsyncadd [#allocation3], 4294966272  ;;  %v304_v0 = vmov 0   ;;  %v33_v1 = vld [vmem:[#allocation2] sm:$0xff]  ;;  %v34_v2 = vld [vmem:[#allocation2 + $0x8] sm:$0xff]  ;;  %vm65_vm0 = vcmask 523264  }
  0x14   :  { %252 = vset.pattern.permute.xlu1 %v304_v0  ;;  %251 = vset.pattern.permute.xlu0 %v304_v0  ;;  %v35_v3 = vld [vmem:[#allocation2 + $0x10] sm:$0xff]  ;;  %v222_v4 = vpack.c.bf16 %v34_v2, %v33_v1  ;;  %v36_v5 = vld [vmem:[#allocation2 + $0x18] sm:$0xff]  ;;  %v37_v7 = vld [vmem:[#allocation2 + $0x20] sm:$0xff] }
  0x15   :  { %v226_v6 = vpack.c.bf16 %v36_v5, %v35_v3  ;;  %v38_v8 = vld [vmem:[#allocation2 + $0x28] sm:$0xff]  ;;  %v29_v9 = vld [vmem:[%s385_s1] sm:$0xff]  ;;  %v31_v10 = vld [vmem:[%s385_s1 + $0x10] sm:$0xff] }
  0x16   :  { %223 = vmatprep.subr.bf16.mxu0 %v222_v4  ;;  %238 = vmatprep.subr.bf16.mxu1 %v222_v4  ;;  %v43_v11 = vld [vmem:[%s386_s2 + $0x10] sm:$0xff]  ;;  %v41_v12 = vld [vmem:[%s386_s2] sm:$0xff]  ;;  %v230_v13 = vpack.c.bf16 %v38_v8, %v37_v7  ;;  %v40_v15 = vld [vmem:[#allocation2 + $0x38] sm:$0xff] }
  0x17   :  { %225 = vmatpush3.bf16.msra.mxu0 %v222_v4  ;;  %242 = vmatpush3.bf16.msra.mxu1 %v222_v4  ;;  %v39_v14 = vld [vmem:[#allocation2 + $0x30] sm:$0xff]  ;;  %v44_v16 = vld [vmem:[%s386_s2 + $0x18] sm:$0xff]  ;;  %v42_v17 = vld [vmem:[%s386_s2 + $0x8] sm:$0xff]  ;;  %s305_s2 = smov [#allocation5]  }
  0x18   :  { %227 = vmatprep.subr.bf16.mxu0 %v226_v6  ;;  %239 = vmatprep.subr.bf16.mxu1 %v226_v6  ;;  %v234_v18 = vpack.c.bf16 %v40_v15, %v39_v14  ;;  %v30_v19 = vld [vmem:[%s385_s1 + $0x8] sm:$0xff]  ;;  %v32_v20 = vld [vmem:[%s385_s1 + $0x18] sm:$0xff]  ;;  %s172_s14 = sshll.u32 %s305_s2, 4  ;;  %s173_s14 = int_to_ptr.vmem [resolvable:$true] %s172_s14 }
  0x19   :  { %216 = vmatprep.mubr.msk.f32.mxu0 %vm65_vm0, %v29_v9  ;;  %219 = vmatprep.mubr.msk.f32.mxu1 %vm65_vm0, %v31_v10  ;;  %s275_s1 = scalar_lea.vmem %s173_s14, 512  ;;  %p280_p9 = scmp.lt.s32.totalorder %s173_s14, %s173_s14 }
  0x1a   :  { %57 = vperm.xlu1 %252, %v43_v11   ;;  %47 = vperm.xlu0 %251, %v41_v12   ;;  %p276_p8 = scmp.ne.s32.totalorder %s173_s14, %s275_s1  ;;  %p281_p10 = scmp.lt.s32.totalorder %s275_s1, %s275_s1 }
  0x1b   :  { %229 = vmatpush3.bf16.msra.mxu0 %v226_v6  ;;  %243 = vmatpush3.bf16.msra.mxu1 %v226_v6 }
  0x1c   :  { %231 = vmatprep.subr.bf16.mxu0 %v230_v13  ;;  %240 = vmatprep.subr.bf16.mxu1 %v230_v13  ;;  %p282_p11 = por %p281_p10, %p280_p9 }
  0x1e   :  { %62 = vperm.xlu1 %252, %v44_v16   ;;  %52 = vperm.xlu0 %251, %v42_v17   ;;  %p283_p12 = pnand %p282_p11, %p276_p8 }
  0x1f   :  { %233 = vmatpush3.bf16.msra.mxu0 %v230_v13  ;;  %244 = vmatpush3.bf16.msra.mxu1 %v230_v13 }
  0x20   :  { %235 = vmatprep.subr.bf16.mxu0 %v234_v18  ;;  %241 = vmatprep.subr.bf16.mxu1 %v234_v18 }
  0x23   :  { %237 = vmatpush3.bf16.msra.mxu0 %v234_v18  ;;  %245 = vmatpush3.bf16.msra.mxu1 %v234_v18 }
  0x26   :  { %217 = vmatmul.mubr.msk.f32.vlgmr.msra.gmra.mrb[0].mxu0 %vm65_vm0, %v30_v19  ;;  %220 = vmatmul.mubr.msk.f32.vlgmr.msra.gmra.mrb[0].mxu1 %vm65_vm0, %v32_v20 }
  0x99   :  { %v58_v21 = vpop.permute.xlu1 %57  ;;  %v48_v22 = vpop.permute.xlu0 %47 }
  0x9d   :  { %v63_v23 = vpop.permute.xlu1 %62  ;;  %v53_v24 = vpop.permute.xlu0 %52 }
  0xf9   :  { %v218_v25 = vpop.f32.mrb[0].mxu0  ;;  %v221_v26 = vpop.f32.mrb[0].mxu1 }
  0xfa   :  { %v150_v27 = vadd.f32 %v218_v25, %v53_v24  ;;  %v160_v28 = vadd.f32 %v221_v26, %v63_v23  ;;  %v144_v29 = vpop.f32.mrb[1].mxu0  ;;  %v154_v30 = vpop.f32.mrb[1].mxu1 }
  0xfb   :  { %v145_v31 = vadd.f32 %v144_v29, %v48_v22  ;;  %v155_v32 = vadd.f32 %v154_v30, %v58_v21 }
  0xfc   :  { %164 = vst [vmem:[#allocation5 + $0x8] sm:$0xff] %v150_v27  ;;  %166 = vst [vmem:[#allocation5 + $0x18] sm:$0xff] %v160_v28 }
  0xfd   :  { %163 = vst [vmem:[#allocation5] sm:$0xff] %v145_v31  ;;  %165 = vst [vmem:[#allocation5 + $0x10] sm:$0xff] %v155_v32 }
  0xfe   :  { %286 = shalt.err (!%p283_p12)
}
  0xff   :  { %s287_s17 = scalar_lea.hbm %s387_s3, 512 }
 0x100   :  { %p288_p13 = scmp.ne.s32.totalorder %s387_s3, %s287_s17  ;;  %p291_p0 = scmp.lt.u32.totalorder %s287_s17, %s387_s3 }
 0x102   :  { %p293_p1 = pnand %p291_p0, %p288_p13 }
 0x104   :  { %296 = shalt.err (!%p293_p1)
}
 0x105   :  { %178 = dma.vmem_to_hbm [thread:$0]  %s173_s14, 512, %s387_s3, [#allocation4], %s302_s22, %s302_s22, %s303_s23  }
 0x106   :  { %299 = dma.done.wait [#allocation4], 512  }
 0x107   :  { %300 = vsyncadd [#allocation4], 4294966784 }
 0x108   :  { %182 = vsyncpa [#allocation3], 1 }
 0x109   :  { %183 = vsyncpa [#allocation4], 1 }

</bundles_post_ra>
